<compile_context>
chip_gen: v6e
topology: v6e:2x2x1
jax: 0.10.0
libtpu: 0.0.40
codegen_flags: <defaults>
</compile_context>

<pallas_src>
import math
from functools import partial

import jax
import jax.numpy as jnp
from jax.experimental import pallas as pl
from jax.experimental.pallas import tpu as pltpu


def _gelu_tanh(x):
    # GELU with tanh approximation (matches nn.GELU(approximate='tanh')).
    c = math.sqrt(2.0 / math.pi)
    return 0.5 * x * (1.0 + jnp.tanh(c * (x + 0.044715 * x * x * x)))


def _round_up(a, b):
    return -(-a // b) * b


def _pad2d(a, rows, cols):
    pr, pc = rows - a.shape[0], cols - a.shape[1]
    if pr or pc:
        a = jnp.pad(a, ((0, pr), (0, pc)))
    return a


def _vmem_caps():
    """Returns (tile budget, physical VMEM capacity) in bytes, per generation."""
    cap = 64 << 20  # conservative fallback = v7x per-TC VMEM
    try:
        info = pltpu.get_tpu_info()
        cap = int(getattr(info, "vmem_capacity_bytes", cap)) or cap
    except Exception:
        pass
    # Leave headroom for compiler-internal scratch: ~52 MiB on 64 MiB parts,
    # ~108 MiB on 128 MiB parts.
    budget = min(cap - (12 << 20), int(cap * 0.85))
    return budget, cap


def _choose_hidden_tile(h_base):
    """Pick streamed hidden block th and H_pad (a multiple of th).

    Prefer MXU-shaped blocks (multiples of 256/512); pad H up to a multiple of
    th (zero padding is numerically neutral) rather than shrinking th, as long
    as the padding overhead stays small.
    """
    if h_base <= 512:
        return h_base, h_base
    for th in (512, 256, 128):
        h_pad = _round_up(h_base, th)
        if h_pad - h_base <= max(h_base // 8, 128):
            return th, h_pad
    return 128, h_base


def _plan_row_tile(m, e_pad, h_pad, th, act_bytes, w_bytes, budget):
    """Pick (tm, th_eff, footprint_bytes) against the VMEM budget."""
    # Round small-M tiles to the dtype's sublane packing (8 f32 / 16 bf16 / 32 i8).
    sub = {4: 8, 2: 16, 1: 32}.get(act_bytes, 8)
    # Keep at least 2 row tiles when M allows it (megacore / v7x dual-TC).
    tm_cap = _round_up(max(-(-m // 2), sub), sub) if m > sub else sub

    def footprint(tm, th_eff):
        n_h = h_pad // th_eff
        f = 4 * tm * e_pad * act_bytes                       # x + out (double-buffered)
        if n_h > 1:
            f += tm * e_pad * 4                              # f32 accumulator scratch
        f += tm * th_eff * (4 + w_bytes)                     # gelu intermediate + cast
        f += 2 * (2 * e_pad * th_eff + th_eff + e_pad) * w_bytes  # weights + biases
        return f

    base = (1024, 768, 512, 384, 256, 128, 64, 32, 16, 8)
    cands = sorted({min(c, tm_cap) for c in base if c % sub == 0} | {sub},
                   reverse=True)

    # Prefer fully VMEM-resident weights (read from HBM exactly once) as long
    # as the row tile does not degenerate below MXU-friendly sizes.
    tm_floor = min(256, tm_cap)
    for tm in cands:
        if tm >= tm_floor and footprint(tm, h_pad) <= budget:
            return tm, h_pad, footprint(tm, h_pad)
    # Otherwise stream (E_pad, th)/(th, E_pad) weight blocks with the largest
    # fitting row tile: flops per streamed weight byte ~ tm.
    for tm in cands:
        if footprint(tm, th) <= budget:
            return tm, th, footprint(tm, th)
    return sub, th, footprint(sub, th)


def _make_mlp_kernel(n_h_steps):
    def kernel(x_ref, w_fc_ref, b_fc_ref, w_pr_ref, b_pr_ref, o_ref, *scratch):
        # First matmul on the MXU (native operand dtype, f32 accumulation),
        # then bias + tanh-GELU in f32 (elementwise over the hidden block).
        h = jnp.dot(x_ref[...], w_fc_ref[...], preferred_element_type=jnp.float32)
        h = _gelu_tanh(h + b_fc_ref[...].astype(jnp.float32))
        # Partial projection for this hidden block.
        part = jnp.dot(h.astype(w_pr_ref.dtype), w_pr_ref[...],
                       preferred_element_type=jnp.float32)

        if n_h_steps == 1:
            # Weights resident: single hidden step, no accumulator round-trip.
            o_ref[...] = (part + b_pr_ref[...].astype(jnp.float32)).astype(o_ref.dtype)
        else:
            acc_ref = scratch[0]
            j = pl.program_id(1)

            @pl.when(j == 0)
            def _():
                acc_ref[...] = part

            @pl.when(jnp.logical_and(j > 0, j < n_h_steps - 1))
            def _():
                acc_ref[...] += part

            # Fused epilogue: fold the final partial + bias straight into the
            # output store (saves one (tm, E_pad) f32 store + reload).
            @pl.when(j == n_h_steps - 1)
            def _():
                o_ref[...] = (acc_ref[...] + part
                              + b_pr_ref[...].astype(jnp.float32)).astype(o_ref.dtype)

    return kernel


@partial(jax.jit, static_argnames=("E", "th"))
def _mlp_forward_impl(x, w_fc_p, b_fc_p, w_pr_p, b_pr_p, *, E, th):
    B, T, _ = x.shape
    M = B * T
    E_pad, H_pad = w_fc_p.shape
    act_bytes = jnp.dtype(x.dtype).itemsize
    w_bytes = jnp.dtype(w_fc_p.dtype).itemsize

    budget, cap = _vmem_caps()
    tm, th_eff, fp = _plan_row_tile(M, E_pad, H_pad, th, act_bytes, w_bytes, budget)
    M_pad = _round_up(M, tm)
    n_row_tiles = M_pad // tm
    n_h_steps = H_pad // th_eff

    x2 = _pad2d(x.reshape(M, E), M_pad, E_pad)

    vmem_limit = int(min(cap - (4 << 20), max(32 << 20, int(fp * 1.25))))

    weight_bytes = (2 * E_pad * H_pad + H_pad + E_pad) * w_bytes
    weight_passes = 1 if n_h_steps == 1 else n_row_tiles  # streamed → re-read per row tile
    cost = pl.CostEstimate(
        flops=4 * M_pad * E_pad * H_pad,                   # two matmuls
        transcendentals=M_pad * H_pad,                     # tanh in gelu
        bytes_accessed=(2 * M_pad * E_pad * act_bytes + weight_passes * weight_bytes),
    )

    scratch = [] if n_h_steps == 1 else [pltpu.VMEM((tm, E_pad), jnp.float32)]

    out = pl.pallas_call(
        _make_mlp_kernel(n_h_steps),
        out_shape=jax.ShapeDtypeStruct((M_pad, E_pad), x.dtype),
        grid_spec=pltpu.PrefetchScalarGridSpec(
            num_scalar_prefetch=0,
            grid=(n_row_tiles, n_h_steps),
            in_specs=[
                pl.BlockSpec((tm, E_pad), lambda i, j: (i, 0)),      # x tile
                pl.BlockSpec((E_pad, th_eff), lambda i, j: (0, j)),  # W_fc block
                pl.BlockSpec((1, th_eff), lambda i, j: (0, j)),      # b_fc block
                pl.BlockSpec((th_eff, E_pad), lambda i, j: (j, 0)),  # W_proj block
                pl.BlockSpec((1, E_pad), lambda i, j: (0, 0)),       # b_proj
            ],
            out_specs=pl.BlockSpec((tm, E_pad), lambda i, j: (i, 0)),
            scratch_shapes=scratch,
        ),
        compiler_params=pltpu.CompilerParams(
            dimension_semantics=("parallel", "arbitrary"),
            vmem_limit_bytes=vmem_limit,
        ),
        cost_estimate=cost,
    )(x2, w_fc_p, b_fc_p, w_pr_p, b_pr_p)

    return out[:M, :E].reshape(B, T, E)


def prepare_mlp_params(w_fc, b_fc, w_proj, b_proj):
    """Pad / lay out the Linear weights ONCE, outside the per-call hot path.

    w_fc: [n_embd, 4*n_embd], w_proj: [4*n_embd, n_embd] ([in, out] layout,
    i.e. the transpose of torch.nn.Linear.weight); biases are [out].
    """
    E, H = w_fc.shape
    E_pad = _round_up(E, 128)
    H_base = _round_up(H, 128)
    th, H_pad = _choose_hidden_tile(H_base)
    params = dict(
        w_fc=_pad2d(jnp.asarray(w_fc), E_pad, H_pad),
        b_fc=_pad2d(jnp.asarray(b_fc).reshape(1, H), 1, H_pad),
        w_proj=_pad2d(jnp.asarray(w_proj), H_pad, E_pad),
        b_proj=_pad2d(jnp.asarray(b_proj).reshape(1, E), 1, E_pad),
    )
    meta = dict(E=E, H=H, th=th)
    return params, meta


def mlp_forward(x, params, meta):
    """x: [B, T, n_embd] -> [B, T, n_embd]."""
    return _mlp_forward_impl(x, params["w_fc"], params["b_fc"],
                             params["w_proj"], params["b_proj"],
                             E=meta["E"], th=meta["th"])


def _reference(x, w_fc, b_fc, w_proj, b_proj):
    h = jnp.einsum("bte,eh->bth", x, w_fc) + b_fc
    h = _gelu_tanh(h)
    return jnp.einsum("bth,he->bte", h, w_proj) + b_proj


if __name__ == "__main__":
    # Small, MLP-consistent shapes: batch=2, seq=8, n_embd=32 -> hidden=128.
    B, T, E = 2, 8, 32
    H = 4 * E

    key = jax.random.PRNGKey(0)
    kx, k1, k2, k3, k4 = jax.random.split(key, 5)

    x = jax.random.normal(kx, (B, T, E), dtype=jnp.float32)
    # Deterministic synthetic parameters (Linear weights stored as [in, out]).
    w_fc = jax.random.normal(k1, (E, H), dtype=jnp.float32) * 0.02
    b_fc = jax.random.normal(k2, (H,), dtype=jnp.float32) * 0.02
    w_proj = jax.random.normal(k3, (H, E), dtype=jnp.float32) * 0.02
    b_proj = jax.random.normal(k4, (E,), dtype=jnp.float32) * 0.02

    params, meta = prepare_mlp_params(w_fc, b_fc, w_proj, b_proj)
    y = mlp_forward(x, params, meta)
    jax.block_until_ready(y)

    y_ref = _reference(x, w_fc, b_fc, w_proj, b_proj)
    assert y.shape == (B, T, E)
    assert jnp.allclose(y, y_ref, atol=2e-5, rtol=2e-5), "mismatch vs reference"

    print("KERNEL_OK")
</pallas_src>

<mosaic_0001>
module attributes {stable_mosaic.version = 11 : i64} {
  func.func @kernel(%arg0: i32, %arg1: i32, %arg2: memref<8x128xf32, #tpu.memory_space<vmem>>, %arg3: memref<128x128xf32, #tpu.memory_space<vmem>>, %arg4: memref<1x128xf32, #tpu.memory_space<vmem>>, %arg5: memref<128x128xf32, #tpu.memory_space<vmem>>, %arg6: memref<1x128xf32, #tpu.memory_space<vmem>>, %arg7: memref<8x128xf32, #tpu.memory_space<vmem>>) attributes {dimension_semantics = [#tpu.dimension_semantics<parallel>, #tpu.dimension_semantics<arbitrary>], iteration_bounds = array<i64: 2, 1>, scalar_prefetch = 0 : i64, scratch_operands = 0 : i64, tpu.core_type = #tpu.core_type<tc>, window_params = [{transform_indices = @transform_0, window_bounds = array<i64: 8, 128>}, {transform_indices = @transform_1, window_bounds = array<i64: 128, 128>}, {transform_indices = @transform_2, window_bounds = array<i64: 1, 128>}, {transform_indices = @transform_3, window_bounds = array<i64: 128, 128>}, {pipeline_mode = #tpu.pipeline_mode<synchronous>, transform_indices = @transform_4, window_bounds = array<i64: 1, 128>}, {transform_indices = @transform_5, window_bounds = array<i64: 8, 128>}]} {
    %c0 = arith.constant 0 : index
    %c0_0 = arith.constant 0 : index
    %0 = vector.load %arg2[%c0, %c0_0] : memref<8x128xf32, #tpu.memory_space<vmem>>, vector<8x128xf32>
    %c0_1 = arith.constant 0 : index
    %c0_2 = arith.constant 0 : index
    %1 = vector.load %arg3[%c0_1, %c0_2] : memref<128x128xf32, #tpu.memory_space<vmem>>, vector<128x128xf32>
    %cst = arith.constant dense<0.000000e+00> : vector<8x128xf32>
    %2 = tpu.matmul %0, %1, %cst {dimension_numbers = #tpu.dot_dimension_numbers<[1], [0], [0], [1], [0, 0, 1, 1], [], []>} : vector<8x128xf32>, vector<128x128xf32>, vector<8x128xf32> -> vector<8x128xf32>
    %c0_3 = arith.constant 0 : index
    %c0_4 = arith.constant 0 : index
    %3 = vector.load %arg4[%c0_3, %c0_4] : memref<1x128xf32, #tpu.memory_space<vmem>>, vector<1x128xf32>
    %4 = vector.broadcast %3 : vector<1x128xf32> to vector<8x128xf32>
    %5 = arith.addf %2, %4 : vector<8x128xf32>
    %cst_5 = arith.constant 5.000000e-01 : f32
    %6 = vector.broadcast %cst_5 : f32 to vector<8x128xf32>
    %7 = arith.mulf %6, %5 : vector<8x128xf32>
    %cst_6 = arith.constant 4.471500e-02 : f32
    %8 = vector.broadcast %cst_6 : f32 to vector<8x128xf32>
    %9 = arith.mulf %8, %5 : vector<8x128xf32>
    %10 = arith.mulf %9, %5 : vector<8x128xf32>
    %11 = arith.mulf %10, %5 : vector<8x128xf32>
    %12 = arith.addf %5, %11 : vector<8x128xf32>
    %cst_7 = arith.constant 0.797884583 : f32
    %13 = vector.broadcast %cst_7 : f32 to vector<8x128xf32>
    %14 = arith.mulf %13, %12 : vector<8x128xf32>
    %15 = math.tanh %14 : vector<8x128xf32>
    %cst_8 = arith.constant 1.000000e+00 : f32
    %16 = vector.broadcast %cst_8 : f32 to vector<8x128xf32>
    %17 = arith.addf %16, %15 : vector<8x128xf32>
    %18 = arith.mulf %7, %17 : vector<8x128xf32>
    %c0_9 = arith.constant 0 : index
    %c0_10 = arith.constant 0 : index
    %19 = vector.load %arg5[%c0_9, %c0_10] : memref<128x128xf32, #tpu.memory_space<vmem>>, vector<128x128xf32>
    %cst_11 = arith.constant dense<0.000000e+00> : vector<8x128xf32>
    %20 = tpu.matmul %18, %19, %cst_11 {dimension_numbers = #tpu.dot_dimension_numbers<[1], [0], [0], [1], [0, 0, 1, 1], [], []>} : vector<8x128xf32>, vector<128x128xf32>, vector<8x128xf32> -> vector<8x128xf32>
    %c0_12 = arith.constant 0 : index
    %c0_13 = arith.constant 0 : index
    %21 = vector.load %arg6[%c0_12, %c0_13] : memref<1x128xf32, #tpu.memory_space<vmem>>, vector<1x128xf32>
    %22 = vector.broadcast %21 : vector<1x128xf32> to vector<8x128xf32>
    %23 = arith.addf %20, %22 : vector<8x128xf32>
    %c0_14 = arith.constant 0 : index
    %c0_15 = arith.constant 0 : index
    %24 = vector.load %arg7[%c0_14, %c0_15] : memref<8x128xf32, #tpu.memory_space<vmem>>, vector<8x128xf32>
    tpu.vector_store %arg7[%c0_14, %c0_15], %23 {strides = array<i32>} : memref<8x128xf32, #tpu.memory_space<vmem>>, vector<8x128xf32>,
    return
  }
  func.func @transform_0(%arg0: i32, %arg1: i32) -> (i32, i32) {
    %c0_i32 = arith.constant 0 : i32
    %c0_i32_0 = arith.constant 0 : i32
    return %arg0, %c0_i32 : i32, i32
  }
  func.func @transform_1(%arg0: i32, %arg1: i32) -> (i32, i32) {
    %c0_i32 = arith.constant 0 : i32
    %c0_i32_0 = arith.constant 0 : i32
    return %c0_i32, %arg1 : i32, i32
  }
  func.func @transform_2(%arg0: i32, %arg1: i32) -> (i32, i32) {
    %c0_i32 = arith.constant 0 : i32
    %c0_i32_0 = arith.constant 0 : i32
    return %c0_i32, %arg1 : i32, i32
  }
  func.func @transform_3(%arg0: i32, %arg1: i32) -> (i32, i32) {
    %c0_i32 = arith.constant 0 : i32
    %c0_i32_0 = arith.constant 0 : i32
    return %arg1, %c0_i32 : i32, i32
  }
  func.func @transform_4(%arg0: i32, %arg1: i32) -> (i32, i32) {
    %c0_i32 = arith.constant 0 : i32
    %c0_i32_0 = arith.constant 0 : i32
    %c0_i32_1 = arith.constant 0 : i32
    return %c0_i32, %c0_i32_0 : i32, i32
  }
  func.func @transform_5(%arg0: i32, %arg1: i32) -> (i32, i32) {
    %c0_i32 = arith.constant 0 : i32
    %c0_i32_0 = arith.constant 0 : i32
    return %arg0, %c0_i32 : i32, i32
  }
}

</mosaic_0001>

<bundles_post_ra>
// kernel: _mlp_forward_impl.1
= control target key start
LH: loop header
LB: loop body
LE: loop exit
PB: predicated region body
PF: predicated region fallthrough
CT: control target
= control target key end

     0   :  { %10 = vsyncpa [#allocation3], 0  ;;  %s1009_s0 = inlined_call_operand.vmem [shape: f32[16,128], index: 0, kind: input, shape index: {}]   ;;  %s1010_s1 = inlined_call_operand.hbm [shape: f32[128,128], index: 1, kind: input, shape index: {}]   ;;  %s1011_s2 = inlined_call_operand.vmem [shape: f32[1,128], index: 2, kind: input, shape index: {}]   ;;  %s1012_s3 = inlined_call_operand.hbm [shape: f32[128,128], index: 3, kind: input, shape index: {}]   ;;  %s1013_s4 = inlined_call_operand.vmem [shape: f32[1,128], index: 4, kind: input, shape index: {}]   ;;  %s1014_s5 = inlined_call_operand.vmem [shape: f32[16,128], index: 5, kind: output, shape index: {}]  }
   0x1   :  { %11 = vsyncpa [#allocation5], 0  ;;  %s880_s18 = smov 0   ;;  %s882_s19 = smov 0  }
   0x2   :  { %s884_s20 = smov 0  }
   0x3 LB: > { %s589_s21 = sadd.s32 4294967295, %s842_s20   ;;  %s29_s22 = sadd.s32 1, %s838_s19  ;;  %s842_s20 = sphi %s884_s20, %s17_s20   ;;  %s838_s19 = sphi %s882_s19, %s1019_s19   ;;  %s834_s18 = sphi %s880_s18, %s1018_s18  }
   0x4   : > { %p31_p0 = scmp.ge.s32.totalorder %s29_s22, 2  ;;  %p591_p1 = scmp.ge.s32.totalorder %s842_s20, 1 }
   0x5   : > { %p185_p2 = scmp.lt.s32.totalorder %s842_s20, 3  ;;  %p905_p4 = scmp.eq.s32.totalorder %s589_s21, 0 }
   0x6   : > { %s1021_s22 = smov (%p31_p0, %s29_s22), 0  ;;  %s844_s25 = smov [#allocation2]  }
   0x7   : > { %p901_p3 = pnand %p591_p1, %p185_p2  ;;  %s199_s26 = sshll.u32 %s844_s25, 4  ;;  %s200_s26 = int_to_ptr.vmem [resolvable:$true] %s199_s26 }
   0x8   : > { %s845_s28 = smov [#allocation4]   ;;  %s771_s30 = scalar_lea.vmem %s200_s26, 2048 }
   0x9   : > { %p717_p5 = pneg %p901_p3  ;;  %s221_s29 = sshll.u32 %s845_s28, 4  ;;  %s222_s29 = int_to_ptr.vmem [resolvable:$true] %s221_s29 }
   0xa   : > { %p772_p8 = scmp.ne.s32.totalorder %s200_s26, %s771_s30  ;;  %p779_p11 = scmp.lt.s32.totalorder %s200_s26, %s200_s26 }
   0xb   : > { %p913_p6 = pnand %p905_p4, %p717_p5  ;;  %p780_p12 = scmp.lt.s32.totalorder %s771_s30, %s771_s30 }
   0xd   : > { %p762_p7 = pneg %p913_p6  ;;  %p781_p13 = por %p780_p12, %p779_p11 }
   0xf   : > { %p774_p9 = pnand %p772_p8, %p762_p7 }
  0x11   : > { %p775_p10 = pneg %p774_p9 }
  0x13   : > { %p782_p0 = pnand %p781_p13, %p775_p10 }
  0x15   : > { %785 = shalt.err (!%p782_p0)
}
  0x16   : > { %s846_s6 = smov 128   ;;  %s847_s7 = smov 8  }
  0x17   : > { %720 = dma.hbm_to_vmem [thread:$0]  (!%p913_p6), %s1010_s1, 2048, %s200_s26, [#allocation3], %s846_s6, %s846_s6, %s847_s7  }
  0x18   : > { %s797_s10 = scalar_lea.vmem %s222_s29, 2048  ;;  %p805_p8 = scmp.lt.s32.totalorder %s222_s29, %s222_s29 }
  0x19   : > { %p798_p1 = scmp.ne.s32.totalorder %s222_s29, %s797_s10  ;;  %p806_p9 = scmp.lt.s32.totalorder %s797_s10, %s797_s10 }
  0x1b   : > { %p800_p2 = pnand %p798_p1, %p762_p7  ;;  %p807_p11 = por %p806_p9, %p805_p8 }
  0x1d   : > { %p801_p5 = pneg %p800_p2 }
  0x1f   : > { %p808_p10 = pnand %p807_p11, %p801_p5 }
  0x21   : > { %811 = shalt.err (!%p808_p10)
}
  0x22   : > { %723 = dma.hbm_to_vmem [thread:$0]  (!%p913_p6), %s1012_s3, 2048, %s222_s29, [#allocation5], %s846_s6, %s846_s6, %s847_s7  }
  0x23   : > { %247 = sbr.rel (%p901_p3) target bundleno = 496 (0x1f0), region = 40 }
  0x28   : > { %825 = dma.done.wait (%p905_p4), [#allocation3], 2048  }
  0x29   : > { %827 = vsyncadd (%p905_p4), [#allocation3], 4294965248 }
  0x2a   : > { %829 = dma.done.wait (%p905_p4), [#allocation5], 2048  }
  0x2b   : > { %831 = vsyncadd (%p905_p4), [#allocation5], 4294965248  ;;  %v848_v0 = vmov 0.0   ;;  %vm849_vm0 = vmmov 0   ;;  %v308_v1 = vld [vmem:[#allocation2 + $0x78] sm:$0xff]  ;;  %v307_v2 = vld [vmem:[#allocation2 + $0x70] sm:$0xff] }
  0x2c   : > { %639 = vmatprep.subr.mxu0 %v848_v0  ;;  %671 = vmatprep.mubr.msk.f32.mxu0 %vm849_vm0, %v848_v0  ;;  %v306_v3 = vld [vmem:[#allocation2 + $0x68] sm:$0xff]  ;;  %v305_v4 = vld [vmem:[#allocation2 + $0x60] sm:$0xff]  ;;  %v304_v5 = vld [vmem:[#allocation2 + $0x58] sm:$0xff]  ;;  %p280_p3 = scmp.lt.s32.totalorder %s834_s18, 1 }
  0x2d   : > { %674 = vmatprep.subr.mxu1 %v848_v0  ;;  %706 = vmatprep.mubr.msk.f32.mxu1 %vm849_vm0, %v848_v0  ;;  %v303_v6 = vld [vmem:[#allocation2 + $0x50] sm:$0xff]  ;;  %v302_v7 = vld [vmem:[#allocation2 + $0x48] sm:$0xff]  ;;  %v301_v8 = vld [vmem:[#allocation2 + $0x40] sm:$0xff] }
  0x2e   : > { %640 = vmatpush3.msra.mxu0 %v308_v1  ;;  %v300_v9 = vld [vmem:[#allocation2 + $0x38] sm:$0xff]  ;;  %v299_v10 = vld [vmem:[#allocation2 + $0x30] sm:$0xff]  ;;  %v298_v11 = vld [vmem:[#allocation2 + $0x28] sm:$0xff]  ;;  %s1023_s18 = smov (!%p280_p3, %s834_s18), 1 }
  0x2f   : > { %641 = vmatprep.subr.mxu0 %v848_v0  ;;  %v297_v12 = vld [vmem:[#allocation2 + $0x20] sm:$0xff]  ;;  %v296_v13 = vld [vmem:[#allocation2 + $0x18] sm:$0xff]  ;;  %s599_s13 = sshll.u32 %s1023_s18, 3  ;;  %v295_v14 = vld [vmem:[#allocation2 + $0x10] sm:$0xff] }
  0x30   : > { %642 = vmatpush3.msra.mxu0 %v307_v2  ;;  %v294_v15 = vld [vmem:[#allocation2 + $0x8] sm:$0xff]  ;;  %s283_s16 = scalar_lea.vmem %s1009_s0, %s599_s13  ;;  %v293_v16 = vld [vmem:[#allocation2] sm:$0xff]  ;;  %v410_v18 = vld [vmem:[#allocation4 + $0x78] sm:$0xff]  ;;  %s291_s27 = scalar_lea.vmem %s1014_s5, %s599_s13 }
  0x31   : > { %643 = vmatprep.subr.mxu0 %v848_v0  ;;  %v292_v17 = vld [vmem:[%s283_s16] sm:$0xff]  ;;  %675 = vmatpush3.msra.mxu1 %v410_v18  ;;  %v409_v19 = vld [vmem:[#allocation4 + $0x70] sm:$0xff]  ;;  %v408_v20 = vld [vmem:[#allocation4 + $0x68] sm:$0xff] }
  0x32   : > { %644 = vmatpush3.msra.mxu0 %v306_v3  ;;  %676 = vmatprep.subr.mxu1 %v848_v0  ;;  %v407_v21 = vld [vmem:[#allocation4 + $0x60] sm:$0xff]  ;;  %v406_v22 = vld [vmem:[#allocation4 + $0x58] sm:$0xff]  ;;  %v405_v23 = vld [vmem:[#allocation4 + $0x50] sm:$0xff] }
  0x33   : > { %645 = vmatprep.subr.mxu0 %v848_v0  ;;  %677 = vmatpush3.msra.mxu1 %v409_v19  ;;  %v404_v24 = vld [vmem:[#allocation4 + $0x48] sm:$0xff]  ;;  %v403_v25 = vld [vmem:[#allocation4 + $0x40] sm:$0xff]  ;;  %v402_v26 = vld [vmem:[#allocation4 + $0x38] sm:$0xff] }
  0x34   : > { %646 = vmatpush3.msra.mxu0 %v305_v4  ;;  %678 = vmatprep.subr.mxu1 %v848_v0  ;;  %v401_v27 = vld [vmem:[#allocation4 + $0x30] sm:$0xff]  ;;  %v400_v28 = vld [vmem:[#allocation4 + $0x28] sm:$0xff]  ;;  %v399_v29 = vld [vmem:[#allocation4 + $0x20] sm:$0xff] }
  0x35   : > { %647 = vmatprep.subr.mxu0 %v848_v0  ;;  %679 = vmatpush3.msra.mxu1 %v408_v20  ;;  %v398_v30 = vld [vmem:[#allocation4 + $0x18] sm:$0xff]  ;;  %v397_v31 = vld [vmem:[#allocation4 + $0x10] sm:$0xff]  ;;  %v396_v32 = vld [vmem:[#allocation4 + $0x8] sm:$0xff] }
  0x36   : > { %648 = vmatpush3.msra.mxu0 %v304_v5  ;;  %680 = vmatprep.subr.mxu1 %v848_v0  ;;  %v395_v33 = vld [vmem:[#allocation4] sm:$0xff] }
  0x37   : > { %649 = vmatprep.subr.mxu0 %v848_v0  ;;  %681 = vmatpush3.msra.mxu1 %v407_v21  ;;  %v601_v34 = vld [vmem:[%s1011_s2] ss:$0 sm:$0xff] }
  0x38   : > { %650 = vmatpush3.msra.mxu0 %v303_v6  ;;  %682 = vmatprep.subr.mxu1 %v848_v0  ;;  %v602_v47 = vld [vmem:[%s1013_s4] ss:$0 sm:$0xff] }
  0x39   : > { %651 = vmatprep.subr.mxu0 %v848_v0  ;;  %683 = vmatpush3.msra.mxu1 %v406_v22 }
  0x3a   : > { %652 = vmatpush3.msra.mxu0 %v302_v7  ;;  %684 = vmatprep.subr.mxu1 %v848_v0 }
  0x3b   : > { %653 = vmatprep.subr.mxu0 %v848_v0  ;;  %685 = vmatpush3.msra.mxu1 %v405_v23 }
  0x3c   : > { %654 = vmatpush3.msra.mxu0 %v301_v8  ;;  %686 = vmatprep.subr.mxu1 %v848_v0 }
  0x3d   : > { %655 = vmatprep.subr.mxu0 %v848_v0  ;;  %687 = vmatpush3.msra.mxu1 %v404_v24 }
  0x3e   : > { %656 = vmatpush3.msra.mxu0 %v300_v9  ;;  %688 = vmatprep.subr.mxu1 %v848_v0 }
  0x3f   : > { %657 = vmatprep.subr.mxu0 %v848_v0  ;;  %689 = vmatpush3.msra.mxu1 %v403_v25 }
  0x40   : > { %658 = vmatpush3.msra.mxu0 %v299_v10  ;;  %690 = vmatprep.subr.mxu1 %v848_v0 }
  0x41   : > { %659 = vmatprep.subr.mxu0 %v848_v0  ;;  %691 = vmatpush3.msra.mxu1 %v402_v26 }
  0x42   : > { %660 = vmatpush3.msra.mxu0 %v298_v11  ;;  %692 = vmatprep.subr.mxu1 %v848_v0 }
  0x43   : > { %661 = vmatprep.subr.mxu0 %v848_v0  ;;  %693 = vmatpush3.msra.mxu1 %v401_v27 }
  0x44   : > { %662 = vmatpush3.msra.mxu0 %v297_v12  ;;  %694 = vmatprep.subr.mxu1 %v848_v0 }
  0x45   : > { %663 = vmatprep.subr.mxu0 %v848_v0  ;;  %695 = vmatpush3.msra.mxu1 %v400_v28 }
  0x46   : > { %664 = vmatpush3.msra.mxu0 %v296_v13  ;;  %696 = vmatprep.subr.mxu1 %v848_v0 }
  0x47   : > { %665 = vmatprep.subr.mxu0 %v848_v0  ;;  %697 = vmatpush3.msra.mxu1 %v399_v29 }
  0x48   : > { %666 = vmatpush3.msra.mxu0 %v295_v14  ;;  %698 = vmatprep.subr.mxu1 %v848_v0 }
  0x49   : > { %667 = vmatprep.subr.mxu0 %v848_v0  ;;  %699 = vmatpush3.msra.mxu1 %v398_v30 }
  0x4a   : > { %668 = vmatpush3.msra.mxu0 %v294_v15  ;;  %700 = vmatprep.subr.mxu1 %v848_v0 }
  0x4b   : > { %669 = vmatprep.subr.mxu0 %v848_v0  ;;  %701 = vmatpush3.msra.mxu1 %v397_v31 }
  0x4c   : > { %670 = vmatpush3.msra.mxu0 %v293_v16  ;;  %702 = vmatprep.subr.mxu1 %v848_v0 }
  0x4d   : > { %672 = vmatmul.mubr.f32.vlgmr.msra.gmra.mxu0 %v292_v17  ;;  %703 = vmatpush3.msra.mxu1 %v396_v32 }
  0x4e   : > { %704 = vmatprep.subr.mxu1 %v848_v0 }
  0x4f   : > { %705 = vmatpush3.msra.mxu1 %v395_v33 }
 0x10d   : > { %v382_v35 = vpop.f32.mrf.mxu0 }
 0x10e   : > { %v383_v36 = vadd.f32 %v601_v34, %v382_v35 }
 0x10f   : > { %v673_v37 = vpop.f32.mrf.mxu0 }
 0x110   : > { %v387_v38 = vmul.f32 0.044715, %v383_v36  ;;  %v386_v44 = vmul.f32 0.5, %v383_v36 }
 0x112   : > { %v388_v39 = vmul.f32 %v387_v38, %v383_v36 }
 0x114   : > { %v389_v40 = vmul.f32 %v388_v39, %v383_v36 }
 0x116   : > { %v390_v41 = vadd.f32 %v389_v40, %v383_v36 }
 0x118   : > { %v391_v42 = vmul.f32 0.7978846, %v390_v41 }
 0x11a   : > { %758 = vtanh.f32 %v391_v42 }
 0x127   : > { %v759_v43 = vpop.eup %758 }
 0x128   : > { %v393_v45 = vadd.f32 1.0, %v759_v43 }
 0x12a   : > { %v394_v46 = vmul.f32 %v393_v45, %v386_v44 }
 0x12c   : > { %707 = vmatmul.mubr.f32.vlgmr.msra.gmra.mxu1 %v394_v46 }
 0x1ec   : > { %v484_v48 = vpop.f32.mrf.mxu1 }
 0x1ed   : > { %v485_v49 = vadd.f32 %v602_v47, %v484_v48 }
 0x1ee   : > { %v708_v50 = vpop.f32.mrf.mxu1 }
 0x1ef   : > { %488 = vst [vmem:[%s291_s27] sm:$0xff] %v485_v49 }
 0x1f0 PF: > { %s17_s20 = sadd.s32 1, %s842_s20   ;;  %s1018_s18 = smov %s838_s19 }
 0x1f1   : > { %p14_p4 = scmp.ge.s32.totalorder %s17_s20, 4   ;;  %s1019_s19 = smov %s1021_s22 }
 0x1f3   :  { %16 = sbr.rel (!%p14_p4) target bundleno = 3 (0x3), region = 84 }
 0x1f8   :  { %508 = vsyncpa [#allocation3], 1 }
 0x1f9   :  { %510 = vsyncpa [#allocation3 + $0x1], 1 }
 0x1fa   :  { %511 = vsyncpa [#allocation5], 1 }

</bundles_post_ra>
